<compile_context>
chip_gen: v7x
topology: tpu7x:2x2x1
jax: 0.10.0
libtpu: 0.0.40
codegen_flags: <defaults>
</compile_context>

<pallas_src>
import jax
import jax.numpy as jnp
from jax import lax
from jax.experimental import pallas as pl
from jax.experimental.pallas import tpu as pltpu


def make_mha_kernel(*, heads, dim_head, seq_padded, seq_valid):
    inner = heads * dim_head

    def kernel(xq_ref, xkv_ref, wq_ref, wkv_ref, wout_ref, bout_ref, o_ref,
               q_s, kv_s, oh_s):
        # xq_ref:   (1, Tq, D)   bf16  query-tile rows of x
        # xkv_ref:  (1, Np, D)   bf16  all (padded) rows of x
        # wq_ref:   (D, inner)   bf16  (pre-scaled by dim_head**-0.5)
        # wkv_ref:  (D, 2*inner) bf16  [W_k | W_v]
        # wout_ref: (inner, D)   bf16
        # bout_ref: (1, D)       f32
        # q_s:  (Tq, inner)   bf16 scratch — lane-dense Q
        # kv_s: (Np, 2*inner) bf16 scratch — lane-dense K|V
        # oh_s: (Tq, inner)   bf16 scratch — lane-dense concat-heads output
        xq = xq_ref[0]
        xkv = xkv_ref[0]

        # Consolidated, lane-dense projections: one big MXU matmul each
        # (K = D, Nout = inner / 2*inner) instead of 3*H dh-wide matmuls.
        q_s[...] = jnp.dot(xq, wq_ref[...],
                           preferred_element_type=jnp.float32
                           ).astype(jnp.bfloat16)
        kv_s[...] = jnp.dot(xkv, wkv_ref[...],
                            preferred_element_type=jnp.float32
                            ).astype(jnp.bfloat16)

        # Per-head attention. Static loop over a small head count; each
        # iteration stores its result into oh_s, so only one head's (Tq, Np)
        # f32 score matrix is live at a time.
        for h in range(heads):
            lo = h * dim_head
            hi = lo + dim_head
            q = q_s[:, lo:hi]                          # (Tq, dh) bf16
            k = kv_s[:, lo:hi]                         # (Np, dh) bf16
            v = kv_s[:, inner + lo:inner + hi]         # (Np, dh) bf16

            # dots = (q*scale) k^T: scale is folded into W_q; the transpose is
            # expressed via the contraction dims (no explicit relayout).
            dots = lax.dot_general(q, k, (((1,), (1,)), ((), ())),
                                   preferred_element_type=jnp.float32)

            if seq_padded != seq_valid:   # static branch: mask padded keys
                key_ids = lax.broadcasted_iota(jnp.int32, (1, seq_padded), 1)
                dots = jnp.where(key_ids < seq_valid, dots, -jnp.inf)

            # Numerically stable softmax with DEFERRED normalization:
            # p stays unnormalized; 1/l is applied to the f32 PV accumulator.
            m = jnp.max(dots, axis=-1, keepdims=True)          # f32
            p = jnp.exp(dots - m)                              # f32
            l = jnp.sum(p, axis=-1, keepdims=True)             # f32
            pv = jnp.dot(p.astype(jnp.bfloat16), v,
                         preferred_element_type=jnp.float32)   # (Tq, dh) f32
            inv_l = pl.reciprocal(l, approx=True)              # EUP slot
            oh_s[:, lo:hi] = (pv * inv_l).astype(jnp.bfloat16)
            # TODO(synk): attention dropout (rate=0.0) is identity; use
            # pltpu.prng_seed + pltpu.stateful_bernoulli for a nonzero rate.

        # Fused output projection: single (Tq,inner)@(inner,D) matmul + bias.
        o = jnp.dot(oh_s[...], wout_ref[...],
                    preferred_element_type=jnp.float32) + bout_ref[...]
        o_ref[0] = o.astype(o_ref.dtype)

    return kernel


def _vmem_limit_bytes():
    # Generation-aware budget: ~3/4 of physical VMEM, capped at 100 MiB.
    #   v5e/v6e (128 MiB) -> 96 MiB ; v7x (64 MiB) -> 48 MiB.
    cap = 128 * 1024 * 1024
    try:
        cap = int(pltpu.get_tpu_info().vmem_capacity_bytes)
    except Exception:
        pass
    return max(32 * 1024 * 1024, min(cap * 3 // 4, 100 * 1024 * 1024))


def multi_head_attention(x, w_qkv, w_out, b_out, *, heads, dim_head):
    B, N, D = x.shape
    inner = heads * dim_head
    scale = dim_head ** (-0.5)
    assert w_qkv.shape == (D, 3 * inner)
    assert w_out.shape == (inner, D)
    assert b_out.shape == (D,)

    # --- q-tile sizing & (optional) token padding --------------------------
    if N <= 128:
        q_tile, n_pad = N, N
    else:
        q_tile = 128
        n_pad = pl.cdiv(N, q_tile) * q_tile
    n_q = n_pad // q_tile

    x_p = x if n_pad == N else jnp.pad(x, ((0, 0), (0, n_pad - N), (0, 0)))
    x_bf = x_p.astype(jnp.bfloat16)

    # --- one-time weight prep (outside the kernel) --------------------------
    # Fold the softmax scale into W_q (in f32, then a single bf16 rounding).
    w_q = (w_qkv[:, :inner] * scale).astype(jnp.bfloat16)      # (D, inner)
    w_kv = w_qkv[:, inner:].astype(jnp.bfloat16)               # (D, 2*inner)
    w_out_b = w_out.astype(jnp.bfloat16)                       # (inner, D)
    b_out_r = b_out.reshape(1, D).astype(jnp.float32)          # (1, D)

    kernel = make_mha_kernel(heads=heads, dim_head=dim_head,
                             seq_padded=n_pad, seq_valid=N)

    # Advisory cost hint for XLA scheduling around the custom call.
    flops_step = (2 * q_tile * D * inner            # Q projection
                  + 2 * n_pad * D * 2 * inner       # K/V projection
                  + 4 * q_tile * n_pad * inner      # q k^T and p v (all heads)
                  + 2 * q_tile * inner * D)         # output projection
    cost = pl.CostEstimate(
        flops=int(B * n_q * flops_step),
        transcendentals=int(B * n_q * heads * q_tile * n_pad),
        bytes_accessed=int(B * n_q * (2 * q_tile * D + 2 * n_pad * D
                                      + 4 * q_tile * D)
                           + 2 * (w_q.size + w_kv.size + w_out_b.size) + 4 * D),
    )

    out = pl.pallas_call(
        kernel,
        out_shape=jax.ShapeDtypeStruct((B, n_pad, D), x.dtype),
        grid_spec=pltpu.PrefetchScalarGridSpec(
            num_scalar_prefetch=0,
            grid=(B, n_q),
            in_specs=[
                pl.BlockSpec((1, q_tile, D), lambda b, qi: (b, qi, 0)),  # x (Q rows)
                pl.BlockSpec((1, n_pad, D), lambda b, qi: (b, 0, 0)),    # x (K/V rows)
                # TODO(synk): weights are grid-invariant; pipeline_mode=
                # pl.Buffered(1) (or a one-time manual DMA) would drop their
                # default double buffers — matters most inside v7x's 64 MiB.
                pl.BlockSpec((D, inner), lambda b, qi: (0, 0)),
                pl.BlockSpec((D, 2 * inner), lambda b, qi: (0, 0)),
                pl.BlockSpec((inner, D), lambda b, qi: (0, 0)),
                pl.BlockSpec((1, D), lambda b, qi: (0, 0)),
            ],
            out_specs=pl.BlockSpec((1, q_tile, D), lambda b, qi: (b, qi, 0)),
            scratch_shapes=[
                pltpu.VMEM((q_tile, inner), jnp.bfloat16),      # Q (lane-dense)
                pltpu.VMEM((n_pad, 2 * inner), jnp.bfloat16),   # K | V (lane-dense)
                pltpu.VMEM((q_tile, inner), jnp.bfloat16),      # concat-heads out
            ],
        ),
        compiler_params=pltpu.CompilerParams(
            dimension_semantics=("parallel", "parallel"),
            vmem_limit_bytes=_vmem_limit_bytes(),
        ),
        cost_estimate=cost,
    )(x_bf, x_bf, w_q, w_kv, w_out_b, b_out_r)

    return out if n_pad == N else out[:, :N, :]


def mha_reference(x, w_qkv, w_out, b_out, *, heads, dim_head):
    B, N, D = x.shape
    inner = heads * dim_head
    scale = dim_head ** (-0.5)
    qkv = jnp.einsum("bnd,de->bne", x, w_qkv)
    q, k, v = jnp.split(qkv, 3, axis=-1)

    def to_heads(t):
        return t.reshape(B, N, heads, dim_head).transpose(0, 2, 1, 3)

    q, k, v = map(to_heads, (q, k, v))                      # (B, H, N, dh)
    dots = jnp.einsum("bhnd,bhmd->bhnm", q, k) * scale
    attn = jax.nn.softmax(dots, axis=-1)
    out = jnp.einsum("bhnm,bhmd->bhnd", attn, v)
    out = out.transpose(0, 2, 1, 3).reshape(B, N, inner)
    return jnp.einsum("bni,id->bnd", out, w_out) + b_out


if __name__ == "__main__":
    # Small, module-consistent shapes.
    B, N, D = 2, 8, 32
    heads, dim_head = 4, 16
    inner = heads * dim_head

    key = jax.random.PRNGKey(0)
    kx, kq, ko, kb = jax.random.split(key, 4)

    x = jax.random.normal(kx, (B, N, D), dtype=jnp.float32)
    # Deterministic synthetic weights (nn.Linear-like scale).
    w_qkv = jax.random.uniform(kq, (D, 3 * inner), dtype=jnp.float32,
                               minval=-1.0, maxval=1.0) / jnp.sqrt(D)
    w_out = jax.random.uniform(ko, (inner, D), dtype=jnp.float32,
                               minval=-1.0, maxval=1.0) / jnp.sqrt(inner)
    b_out = jax.random.uniform(kb, (D,), dtype=jnp.float32,
                               minval=-0.1, maxval=0.1)

    out = multi_head_attention(x, w_qkv, w_out, b_out,
                               heads=heads, dim_head=dim_head)
    out = jax.block_until_ready(out)

    ref = mha_reference(x, w_qkv, w_out, b_out, heads=heads, dim_head=dim_head)
    assert out.shape == (B, N, D)
    # Tolerance relaxed vs the f32 reference because MXU inputs are bf16
    # (f32 accumulation, f32 softmax, approx reciprocal).
    assert jnp.allclose(out, ref, atol=3e-2, rtol=3e-2), "mismatch vs reference"

    print("KERNEL_OK")
</pallas_src>

<mosaic_0001>
module attributes {stable_mosaic.version = 11 : i64} {
  func.func @kernel(%arg0: i32, %arg1: i32, %arg2: memref<1x8x32xbf16, #tpu.memory_space<vmem>>, %arg3: memref<1x8x32xbf16, #tpu.memory_space<vmem>>, %arg4: memref<32x64xbf16, #tpu.memory_space<vmem>>, %arg5: memref<32x128xbf16, #tpu.memory_space<vmem>>, %arg6: memref<64x32xbf16, #tpu.memory_space<vmem>>, %arg7: memref<1x32xf32, #tpu.memory_space<vmem>>, %arg8: memref<1x8x32xf32, #tpu.memory_space<vmem>>, %arg9: memref<8x64xbf16, #tpu.memory_space<vmem>>, %arg10: memref<8x128xbf16, #tpu.memory_space<vmem>>, %arg11: memref<8x64xbf16, #tpu.memory_space<vmem>>) attributes {dimension_semantics = [#tpu.dimension_semantics<parallel>, #tpu.dimension_semantics<parallel>], iteration_bounds = array<i64: 2, 1>, scalar_prefetch = 0 : i64, scratch_operands = 3 : i64, tpu.core_type = #tpu.core_type<tc>, window_params = [{transform_indices = @transform_0, window_bounds = array<i64: 1, 8, 32>}, {transform_indices = @transform_1, window_bounds = array<i64: 1, 8, 32>}, {pipeline_mode = #tpu.pipeline_mode<synchronous>, transform_indices = @transform_2, window_bounds = array<i64: 32, 64>}, {pipeline_mode = #tpu.pipeline_mode<synchronous>, transform_indices = @transform_3, window_bounds = array<i64: 32, 128>}, {pipeline_mode = #tpu.pipeline_mode<synchronous>, transform_indices = @transform_4, window_bounds = array<i64: 64, 32>}, {pipeline_mode = #tpu.pipeline_mode<synchronous>, transform_indices = @transform_5, window_bounds = array<i64: 1, 32>}, {transform_indices = @transform_6, window_bounds = array<i64: 1, 8, 32>}]} {
    %c0 = arith.constant 0 : index
    %c0_0 = arith.constant 0 : index
    %c0_1 = arith.constant 0 : index
    %0 = vector.load %arg2[%c0, %c0_0, %c0_1] : memref<1x8x32xbf16, #tpu.memory_space<vmem>>, vector<1x8x32xbf16>
    %1 = vector.shape_cast %0 : vector<1x8x32xbf16> to vector<8x32xbf16>
    %c0_2 = arith.constant 0 : index
    %c0_3 = arith.constant 0 : index
    %c0_4 = arith.constant 0 : index
    %2 = vector.load %arg3[%c0_2, %c0_3, %c0_4] : memref<1x8x32xbf16, #tpu.memory_space<vmem>>, vector<1x8x32xbf16>
    %3 = vector.shape_cast %2 : vector<1x8x32xbf16> to vector<8x32xbf16>
    %c0_5 = arith.constant 0 : index
    %c0_6 = arith.constant 0 : index
    %4 = vector.load %arg4[%c0_5, %c0_6] : memref<32x64xbf16, #tpu.memory_space<vmem>>, vector<32x64xbf16>
    %cst = arith.constant dense<0.000000e+00> : vector<8x64xf32>
    %5 = tpu.matmul %1, %4, %cst {dimension_numbers = #tpu.dot_dimension_numbers<[1], [0], [0], [1], [0, 0, 1, 1], [], []>} : vector<8x32xbf16>, vector<32x64xbf16>, vector<8x64xf32> -> vector<8x64xf32>
    %6 = arith.truncf %5 : vector<8x64xf32> to vector<8x64xbf16>
    %c0_7 = arith.constant 0 : index
    %c0_8 = arith.constant 0 : index
    %7 = vector.load %arg9[%c0_7, %c0_8] : memref<8x64xbf16, #tpu.memory_space<vmem>>, vector<8x64xbf16>
    tpu.vector_store %arg9[%c0_7, %c0_8], %6 {strides = array<i32>} : memref<8x64xbf16, #tpu.memory_space<vmem>>, vector<8x64xbf16>,
    %c0_9 = arith.constant 0 : index
    %c0_10 = arith.constant 0 : index
    %8 = vector.load %arg5[%c0_9, %c0_10] : memref<32x128xbf16, #tpu.memory_space<vmem>>, vector<32x128xbf16>
    %cst_11 = arith.constant dense<0.000000e+00> : vector<8x128xf32>
    %9 = tpu.matmul %3, %8, %cst_11 {dimension_numbers = #tpu.dot_dimension_numbers<[1], [0], [0], [1], [0, 0, 1, 1], [], []>} : vector<8x32xbf16>, vector<32x128xbf16>, vector<8x128xf32> -> vector<8x128xf32>
    %10 = arith.truncf %9 : vector<8x128xf32> to vector<8x128xbf16>
    %c0_12 = arith.constant 0 : index
    %c0_13 = arith.constant 0 : index
    %11 = vector.load %arg10[%c0_12, %c0_13] : memref<8x128xbf16, #tpu.memory_space<vmem>>, vector<8x128xbf16>
    tpu.vector_store %arg10[%c0_12, %c0_13], %10 {strides = array<i32>} : memref<8x128xbf16, #tpu.memory_space<vmem>>, vector<8x128xbf16>,
    %c0_14 = arith.constant 0 : index
    %c0_15 = arith.constant 0 : index
    %12 = vector.load %arg9[%c0_14, %c0_15] : memref<8x64xbf16, #tpu.memory_space<vmem>>, vector<8x16xbf16>
    %c0_16 = arith.constant 0 : index
    %c0_17 = arith.constant 0 : index
    %13 = vector.load %arg10[%c0_16, %c0_17] : memref<8x128xbf16, #tpu.memory_space<vmem>>, vector<8x16xbf16>
    %c0_18 = arith.constant 0 : index
    %c64 = arith.constant 64 : index
    %14 = vector.load %arg10[%c0_18, %c64] : memref<8x128xbf16, #tpu.memory_space<vmem>>, vector<8x16xbf16>
    %cst_19 = arith.constant dense<0.000000e+00> : vector<8x8xf32>
    %15 = tpu.matmul %12, %13, %cst_19 {dimension_numbers = #tpu.dot_dimension_numbers<[1], [1], [0], [0], [0, 0, 1, 0], [], []>} : vector<8x16xbf16>, vector<8x16xbf16>, vector<8x8xf32> -> vector<8x8xf32>
    %cst_20 = arith.constant dense<0xFF800000> : vector<8xf32>
    %16 = vector.multi_reduction <maximumf>, %15, %cst_20 [1] : vector<8x8xf32> to vector<8xf32>
    %17 = vector.shape_cast %16 : vector<8xf32> to vector<8x1xf32>
    %18 = vector.broadcast %17 : vector<8x1xf32> to vector<8x8xf32>
    %19 = arith.subf %15, %18 : vector<8x8xf32>
    %20 = math.exp %19 : vector<8x8xf32>
    %cst_21 = arith.constant dense<0.000000e+00> : vector<8xf32>
    %21 = vector.multi_reduction <add>, %20, %cst_21 [1] : vector<8x8xf32> to vector<8xf32>
    %22 = vector.shape_cast %21 : vector<8xf32> to vector<8x1xf32>
    %23 = arith.truncf %20 : vector<8x8xf32> to vector<8x8xbf16>
    %cst_22 = arith.constant dense<0.000000e+00> : vector<8x16xf32>
    %24 = tpu.matmul %23, %14, %cst_22 {dimension_numbers = #tpu.dot_dimension_numbers<[1], [0], [0], [1], [0, 0, 1, 1], [], []>} : vector<8x8xbf16>, vector<8x16xbf16>, vector<8x16xf32> -> vector<8x16xf32>
    %25 = tpu.reciprocal %22 {approx = true} : vector<8x1xf32> -> vector<8x1xf32>
    %26 = vector.broadcast %25 : vector<8x1xf32> to vector<8x16xf32>
    %27 = arith.mulf %24, %26 : vector<8x16xf32>
    %28 = arith.truncf %27 : vector<8x16xf32> to vector<8x16xbf16>
    %c0_23 = arith.constant 0 : index
    %c0_24 = arith.constant 0 : index
    %29 = vector.load %arg11[%c0_23, %c0_24] : memref<8x64xbf16, #tpu.memory_space<vmem>>, vector<8x16xbf16>
    tpu.vector_store %arg11[%c0_23, %c0_24], %28 {strides = array<i32>} : memref<8x64xbf16, #tpu.memory_space<vmem>>, vector<8x16xbf16>,
    %c0_25 = arith.constant 0 : index
    %c16 = arith.constant 16 : index
    %30 = vector.load %arg9[%c0_25, %c16] : memref<8x64xbf16, #tpu.memory_space<vmem>>, vector<8x16xbf16>
    %c0_26 = arith.constant 0 : index
    %c16_27 = arith.constant 16 : index
    %31 = vector.load %arg10[%c0_26, %c16_27] : memref<8x128xbf16, #tpu.memory_space<vmem>>, vector<8x16xbf16>
    %c0_28 = arith.constant 0 : index
    %c80 = arith.constant 80 : index
    %32 = vector.load %arg10[%c0_28, %c80] : memref<8x128xbf16, #tpu.memory_space<vmem>>, vector<8x16xbf16>
    %cst_29 = arith.constant dense<0.000000e+00> : vector<8x8xf32>
    %33 = tpu.matmul %30, %31, %cst_29 {dimension_numbers = #tpu.dot_dimension_numbers<[1], [1], [0], [0], [0, 0, 1, 0], [], []>} : vector<8x16xbf16>, vector<8x16xbf16>, vector<8x8xf32> -> vector<8x8xf32>
    %cst_30 = arith.constant dense<0xFF800000> : vector<8xf32>
    %34 = vector.multi_reduction <maximumf>, %33, %cst_30 [1] : vector<8x8xf32> to vector<8xf32>
    %35 = vector.shape_cast %34 : vector<8xf32> to vector<8x1xf32>
    %36 = vector.broadcast %35 : vector<8x1xf32> to vector<8x8xf32>
    %37 = arith.subf %33, %36 : vector<8x8xf32>
    %38 = math.exp %37 : vector<8x8xf32>
    %cst_31 = arith.constant dense<0.000000e+00> : vector<8xf32>
    %39 = vector.multi_reduction <add>, %38, %cst_31 [1] : vector<8x8xf32> to vector<8xf32>
    %40 = vector.shape_cast %39 : vector<8xf32> to vector<8x1xf32>
    %41 = arith.truncf %38 : vector<8x8xf32> to vector<8x8xbf16>
    %cst_32 = arith.constant dense<0.000000e+00> : vector<8x16xf32>
    %42 = tpu.matmul %41, %32, %cst_32 {dimension_numbers = #tpu.dot_dimension_numbers<[1], [0], [0], [1], [0, 0, 1, 1], [], []>} : vector<8x8xbf16>, vector<8x16xbf16>, vector<8x16xf32> -> vector<8x16xf32>
    %43 = tpu.reciprocal %40 {approx = true} : vector<8x1xf32> -> vector<8x1xf32>
    %44 = vector.broadcast %43 : vector<8x1xf32> to vector<8x16xf32>
    %45 = arith.mulf %42, %44 : vector<8x16xf32>
    %46 = arith.truncf %45 : vector<8x16xf32> to vector<8x16xbf16>
    %c0_33 = arith.constant 0 : index
    %c16_34 = arith.constant 16 : index
    %47 = vector.load %arg11[%c0_33, %c16_34] : memref<8x64xbf16, #tpu.memory_space<vmem>>, vector<8x16xbf16>
    tpu.vector_store %arg11[%c0_33, %c16_34], %46 {strides = array<i32>} : memref<8x64xbf16, #tpu.memory_space<vmem>>, vector<8x16xbf16>,
    %c0_35 = arith.constant 0 : index
    %c32 = arith.constant 32 : index
    %48 = vector.load %arg9[%c0_35, %c32] : memref<8x64xbf16, #tpu.memory_space<vmem>>, vector<8x16xbf16>
    %c0_36 = arith.constant 0 : index
    %c32_37 = arith.constant 32 : index
    %49 = vector.load %arg10[%c0_36, %c32_37] : memref<8x128xbf16, #tpu.memory_space<vmem>>, vector<8x16xbf16>
    %c0_38 = arith.constant 0 : index
    %c96 = arith.constant 96 : index
    %50 = vector.load %arg10[%c0_38, %c96] : memref<8x128xbf16, #tpu.memory_space<vmem>>, vector<8x16xbf16>
    %cst_39 = arith.constant dense<0.000000e+00> : vector<8x8xf32>
    %51 = tpu.matmul %48, %49, %cst_39 {dimension_numbers = #tpu.dot_dimension_numbers<[1], [1], [0], [0], [0, 0, 1, 0], [], []>} : vector<8x16xbf16>, vector<8x16xbf16>, vector<8x8xf32> -> vector<8x8xf32>
    %cst_40 = arith.constant dense<0xFF800000> : vector<8xf32>
    %52 = vector.multi_reduction <maximumf>, %51, %cst_40 [1] : vector<8x8xf32> to vector<8xf32>
    %53 = vector.shape_cast %52 : vector<8xf32> to vector<8x1xf32>
    %54 = vector.broadcast %53 : vector<8x1xf32> to vector<8x8xf32>
    %55 = arith.subf %51, %54 : vector<8x8xf32>
    %56 = math.exp %55 : vector<8x8xf32>
    %cst_41 = arith.constant dense<0.000000e+00> : vector<8xf32>
    %57 = vector.multi_reduction <add>, %56, %cst_41 [1] : vector<8x8xf32> to vector<8xf32>
    %58 = vector.shape_cast %57 : vector<8xf32> to vector<8x1xf32>
    %59 = arith.truncf %56 : vector<8x8xf32> to vector<8x8xbf16>
    %cst_42 = arith.constant dense<0.000000e+00> : vector<8x16xf32>
    %60 = tpu.matmul %59, %50, %cst_42 {dimension_numbers = #tpu.dot_dimension_numbers<[1], [0], [0], [1], [0, 0, 1, 1], [], []>} : vector<8x8xbf16>, vector<8x16xbf16>, vector<8x16xf32> -> vector<8x16xf32>
    %61 = tpu.reciprocal %58 {approx = true} : vector<8x1xf32> -> vector<8x1xf32>
    %62 = vector.broadcast %61 : vector<8x1xf32> to vector<8x16xf32>
    %63 = arith.mulf %60, %62 : vector<8x16xf32>
    %64 = arith.truncf %63 : vector<8x16xf32> to vector<8x16xbf16>
    %c0_43 = arith.constant 0 : index
    %c32_44 = arith.constant 32 : index
    %65 = vector.load %arg11[%c0_43, %c32_44] : memref<8x64xbf16, #tpu.memory_space<vmem>>, vector<8x16xbf16>
    tpu.vector_store %arg11[%c0_43, %c32_44], %64 {strides = array<i32>} : memref<8x64xbf16, #tpu.memory_space<vmem>>, vector<8x16xbf16>,
    %c0_45 = arith.constant 0 : index
    %c48 = arith.constant 48 : index
    %66 = vector.load %arg9[%c0_45, %c48] : memref<8x64xbf16, #tpu.memory_space<vmem>>, vector<8x16xbf16>
    %c0_46 = arith.constant 0 : index
    %c48_47 = arith.constant 48 : index
    %67 = vector.load %arg10[%c0_46, %c48_47] : memref<8x128xbf16, #tpu.memory_space<vmem>>, vector<8x16xbf16>
    %c0_48 = arith.constant 0 : index
    %c112 = arith.constant 112 : index
    %68 = vector.load %arg10[%c0_48, %c112] : memref<8x128xbf16, #tpu.memory_space<vmem>>, vector<8x16xbf16>
    %cst_49 = arith.constant dense<0.000000e+00> : vector<8x8xf32>
    %69 = tpu.matmul %66, %67, %cst_49 {dimension_numbers = #tpu.dot_dimension_numbers<[1], [1], [0], [0], [0, 0, 1, 0], [], []>} : vector<8x16xbf16>, vector<8x16xbf16>, vector<8x8xf32> -> vector<8x8xf32>
    %cst_50 = arith.constant dense<0xFF800000> : vector<8xf32>
    %70 = vector.multi_reduction <maximumf>, %69, %cst_50 [1] : vector<8x8xf32> to vector<8xf32>
    %71 = vector.shape_cast %70 : vector<8xf32> to vector<8x1xf32>
    %72 = vector.broadcast %71 : vector<8x1xf32> to vector<8x8xf32>
    %73 = arith.subf %69, %72 : vector<8x8xf32>
    %74 = math.exp %73 : vector<8x8xf32>
    %cst_51 = arith.constant dense<0.000000e+00> : vector<8xf32>
    %75 = vector.multi_reduction <add>, %74, %cst_51 [1] : vector<8x8xf32> to vector<8xf32>
    %76 = vector.shape_cast %75 : vector<8xf32> to vector<8x1xf32>
    %77 = arith.truncf %74 : vector<8x8xf32> to vector<8x8xbf16>
    %cst_52 = arith.constant dense<0.000000e+00> : vector<8x16xf32>
    %78 = tpu.matmul %77, %68, %cst_52 {dimension_numbers = #tpu.dot_dimension_numbers<[1], [0], [0], [1], [0, 0, 1, 1], [], []>} : vector<8x8xbf16>, vector<8x16xbf16>, vector<8x16xf32> -> vector<8x16xf32>
    %79 = tpu.reciprocal %76 {approx = true} : vector<8x1xf32> -> vector<8x1xf32>
    %80 = vector.broadcast %79 : vector<8x1xf32> to vector<8x16xf32>
    %81 = arith.mulf %78, %80 : vector<8x16xf32>
    %82 = arith.truncf %81 : vector<8x16xf32> to vector<8x16xbf16>
    %c0_53 = arith.constant 0 : index
    %c48_54 = arith.constant 48 : index
    %83 = vector.load %arg11[%c0_53, %c48_54] : memref<8x64xbf16, #tpu.memory_space<vmem>>, vector<8x16xbf16>
    tpu.vector_store %arg11[%c0_53, %c48_54], %82 {strides = array<i32>} : memref<8x64xbf16, #tpu.memory_space<vmem>>, vector<8x16xbf16>,
    %c0_55 = arith.constant 0 : index
    %c0_56 = arith.constant 0 : index
    %84 = vector.load %arg11[%c0_55, %c0_56] : memref<8x64xbf16, #tpu.memory_space<vmem>>, vector<8x64xbf16>
    %c0_57 = arith.constant 0 : index
    %c0_58 = arith.constant 0 : index
    %85 = vector.load %arg6[%c0_57, %c0_58] : memref<64x32xbf16, #tpu.memory_space<vmem>>, vector<64x32xbf16>
    %cst_59 = arith.constant dense<0.000000e+00> : vector<8x32xf32>
    %86 = tpu.matmul %84, %85, %cst_59 {dimension_numbers = #tpu.dot_dimension_numbers<[1], [0], [0], [1], [0, 0, 1, 1], [], []>} : vector<8x64xbf16>, vector<64x32xbf16>, vector<8x32xf32> -> vector<8x32xf32>
    %c0_60 = arith.constant 0 : index
    %c0_61 = arith.constant 0 : index
    %87 = vector.load %arg7[%c0_60, %c0_61] : memref<1x32xf32, #tpu.memory_space<vmem>>, vector<1x32xf32>
    %88 = vector.broadcast %87 : vector<1x32xf32> to vector<8x32xf32>
    %89 = arith.addf %86, %88 : vector<8x32xf32>
    %c0_62 = arith.constant 0 : index
    %c0_63 = arith.constant 0 : index
    %c0_64 = arith.constant 0 : index
    %90 = vector.load %arg8[%c0_62, %c0_63, %c0_64] : memref<1x8x32xf32, #tpu.memory_space<vmem>>, vector<1x8x32xf32>
    %91 = vector.shape_cast %90 : vector<1x8x32xf32> to vector<8x32xf32>
    %92 = vector.shape_cast %89 : vector<8x32xf32> to vector<1x8x32xf32>
    tpu.vector_store %arg8[%c0_62, %c0_63, %c0_64], %92 {strides = array<i32>} : memref<1x8x32xf32, #tpu.memory_space<vmem>>, vector<1x8x32xf32>,
    return
  }
  func.func @transform_0(%arg0: i32, %arg1: i32) -> (i32, i32, i32) {
    %c0_i32 = arith.constant 0 : i32
    %c0_i32_0 = arith.constant 0 : i32
    return %arg0, %arg1, %c0_i32 : i32, i32, i32
  }
  func.func @transform_1(%arg0: i32, %arg1: i32) -> (i32, i32, i32) {
    %c0_i32 = arith.constant 0 : i32
    %c0_i32_0 = arith.constant 0 : i32
    %c0_i32_1 = arith.constant 0 : i32
    return %arg0, %c0_i32, %c0_i32_0 : i32, i32, i32
  }
  func.func @transform_2(%arg0: i32, %arg1: i32) -> (i32, i32) {
    %c0_i32 = arith.constant 0 : i32
    %c0_i32_0 = arith.constant 0 : i32
    %c0_i32_1 = arith.constant 0 : i32
    return %c0_i32, %c0_i32_0 : i32, i32
  }
  func.func @transform_3(%arg0: i32, %arg1: i32) -> (i32, i32) {
    %c0_i32 = arith.constant 0 : i32
    %c0_i32_0 = arith.constant 0 : i32
    %c0_i32_1 = arith.constant 0 : i32
    return %c0_i32, %c0_i32_0 : i32, i32
  }
  func.func @transform_4(%arg0: i32, %arg1: i32) -> (i32, i32) {
    %c0_i32 = arith.constant 0 : i32
    %c0_i32_0 = arith.constant 0 : i32
    %c0_i32_1 = arith.constant 0 : i32
    return %c0_i32, %c0_i32_0 : i32, i32
  }
  func.func @transform_5(%arg0: i32, %arg1: i32) -> (i32, i32) {
    %c0_i32 = arith.constant 0 : i32
    %c0_i32_0 = arith.constant 0 : i32
    %c0_i32_1 = arith.constant 0 : i32
    return %c0_i32, %c0_i32_0 : i32, i32
  }
  func.func @transform_6(%arg0: i32, %arg1: i32) -> (i32, i32, i32) {
    %c0_i32 = arith.constant 0 : i32
    %c0_i32_0 = arith.constant 0 : i32
    return %arg0, %arg1, %c0_i32 : i32, i32, i32
  }
}

</mosaic_0001>

<bundles_post_ra>
// kernel: tpu_custom_call.1
= control target key start
LH: loop header
LB: loop body
LE: loop exit
PB: predicated region body
PF: predicated region fallthrough
CT: control target
= control target key end

     0   :  { %s2296_s0 = inlined_call_operand.hbm [shape: bf16[2,8,32], index: 0, kind: input, shape index: {}]   ;;  %s2297_s1 = inlined_call_operand.hbm [shape: bf16[2,8,32], index: 1, kind: input, shape index: {}]   ;;  %s2298_s2 = inlined_call_operand.hbm [shape: bf16[32,64], index: 2, kind: input, shape index: {}]   ;;  %s2299_s3 = inlined_call_operand.hbm [shape: bf16[32,128], index: 3, kind: input, shape index: {}]   ;;  %s2300_s4 = inlined_call_operand.hbm [shape: bf16[64,32], index: 4, kind: input, shape index: {}]   ;;  %s2301_s5 = inlined_call_operand.hbm [shape: f32[1,32], index: 5, kind: input, shape index: {}]   ;;  %s2302_s6 = inlined_call_operand.hbm [shape: f32[2,8,32], index: 6, kind: output, shape index: {}]  }
   0x1   :  { %2308 = sst [smem:[#allocation24_spill]] %s2298_s2 }
   0x2   :  { %2309 = sst [smem:[#allocation25_spill]] %s2299_s3 }
   0x3   :  { %2310 = sst [smem:[#allocation26_spill]] %s2300_s4 }
   0x4   :  { %2311 = sst [smem:[#allocation27_spill]] %s2301_s5 }
   0x5   :  { %11 = vsyncpa [#allocation6], 0 }
   0x6   :  { %13 = vsyncpa [#allocation6 + $0x1], 0 }
   0x7   :  { %14 = vsyncpa [#allocation9], 0 }
   0x8   :  { %16 = vsyncpa [#allocation9 + $0x1], 0 }
   0x9   :  { %17 = vsyncpa [#allocation12], 0 }
   0xa   :  { %18 = vsyncpa [#allocation15], 0 }
   0xb   :  { %19 = vsyncpa [#allocation7], 0 }
   0xc   :  { %21 = vsyncpa [#allocation7 + $0x1], 0  ;;  %s1878_s21 = smov 0   ;;  %s1880_s22 = smov 0  }
   0xd   :  { %s1882_s23 = smov 0   ;;  %s1884_s24 = smov 0  }
   0xe   :  { %s1886_s25 = smov 0   ;;  %s1888_s26 = smov 0  }
   0xf LB: > { %s1909_s27 = sadd.s32 4294967295, %s1823_s26   ;;  %p1245_p0 = scmp.ge.s32.totalorder %s1823_s26, 1  ;;  %s1823_s26 = sphi %s1888_s26, %s27_s26   ;;  %s1819_s25 = sphi %s1886_s25, %s2342_s25   ;;  %s1815_s24 = sphi %s1884_s24, %s2341_s24   ;;  %s1811_s23 = sphi %s1882_s23, %s2340_s23   ;;  %s1807_s22 = sphi %s1880_s22, %s2339_s22   ;;  %s1803_s21 = sphi %s1878_s21, %s2338_s21  }
  0x10   : > { %p2303_p1 = scmp.eq.s32.totalorder %s1909_s27, 0  ;;  %p210_p2 = scmp.lt.s32.totalorder %s1823_s26, 3 }
  0x11   : > { %s1825_s29 = smov [#allocation10]   ;;  %s1826_s8 = smov [#allocation11]  }
  0x12   : > { %p1914_p3 = pnand %p1245_p0, %p210_p2  ;;  %s222_s30 = sshll.u32 %s1825_s29, 4  ;;  %s1918_s30 = int_to_ptr.vmem [resolvable:$true] %s222_s30 }
  0x13   : > { %s235_s9 = sshll.u32 %s1826_s8, 4  ;;  %s1827_s10 = smov [#allocation13]   ;;  %s1929_s9 = int_to_ptr.vmem [resolvable:$true] %s235_s9 }
  0x14   : > { %s2312_s28 = scalar_select %p1914_p3, 1, 0 }
  0x15   : > { %p1425_p4 = pneg %p1914_p3  ;;  %s1931_s11 = sshll.u32 %s1827_s10, 4  ;;  %s249_s11 = int_to_ptr.vmem [resolvable:$true] %s1931_s11 }
  0x16   : > { %s2314_s2 = sld [smem:[#allocation24_spill]] }
  0x17   : > { %p1925_p6 = pnand %p1425_p4, %p2303_p1 }
  0x19   : > { %p1941_p8 = pneg %p1925_p6 }
  0x1c   : > { %s1553_s14 = scalar_lea.hbm %s2314_s2, 256 }
  0x1d   : > { %p1554_p7 = scmp.ne.s32.totalorder %s2314_s2, %s1553_s14  ;;  %p1560_p11 = scmp.lt.u32.totalorder %s1553_s14, %s2314_s2 }
  0x1f   : > { %p1556_p9 = pnand %p1941_p8, %p1554_p7 }
  0x21   : > { %p1557_p10 = pneg %p1556_p9 }
  0x23   : > { %p1562_p12 = pnand %p1560_p11, %p1557_p10 }
  0x25   : > { %1565 = shalt.err (!%p1562_p12)
}
  0x26   : > { %s1566_s20 = scalar_lea.vmem %s1918_s30, 256  ;;  %p1574_p4 = scmp.lt.s32.totalorder %s1918_s30, %s1918_s30 }
  0x27   : > { %p1567_p13 = scmp.ne.s32.totalorder %s1918_s30, %s1566_s20  ;;  %p1575_p5 = scmp.lt.s32.totalorder %s1566_s20, %s1566_s20 }
  0x29   : > { %p1569_p0 = pnand %p1567_p13, %p1941_p8  ;;  %p1576_p7 = por %p1575_p5, %p1574_p4 }
  0x2b   : > { %p1570_p2 = pneg %p1569_p0 }
  0x2d   : > { %p1577_p9 = pnand %p1576_p7, %p1570_p2 }
  0x2f   : > { %1580 = shalt.err (!%p1577_p9)
}
  0x30   : > { %s1828_s29 = smov 64   ;;  %s1829_s8 = smov 4  }
  0x31   : > { %1428 = dma.hbm_to_vmem [thread:$0]  (!%p1925_p6), %s2314_s2, 256, %s1918_s30, [#allocation9], %s1828_s29, %s1828_s29, %s1829_s8  }
  0x32   : > { %s2316_s3 = sld [smem:[#allocation25_spill]] }
  0x38   : > { %s1581_s15 = scalar_lea.hbm %s2316_s3, 256 }
  0x39   : > { %p1582_p5 = scmp.ne.s32.totalorder %s2316_s3, %s1581_s15  ;;  %p1588_p12 = scmp.lt.u32.totalorder %s1581_s15, %s2316_s3 }
  0x3b   : > { %p1584_p10 = pnand %p1582_p5, %p1941_p8 }
  0x3d   : > { %p1585_p11 = pneg %p1584_p10 }
  0x3f   : > { %p1590_p13 = pnand %p1588_p12, %p1585_p11 }
  0x41   : > { %1593 = shalt.err (!%p1590_p13)
}
  0x42   : > { %s1594_s30 = scalar_lea.vmem %s1929_s9, 256  ;;  %p1602_p7 = scmp.lt.s32.totalorder %s1929_s9, %s1929_s9 }
  0x43   : > { %p1595_p0 = scmp.ne.s32.totalorder %s1929_s9, %s1594_s30  ;;  %p1603_p9 = scmp.lt.s32.totalorder %s1594_s30, %s1594_s30 }
  0x45   : > { %p1597_p2 = pnand %p1595_p0, %p1941_p8  ;;  %p1604_p5 = por %p1603_p9, %p1602_p7 }
  0x47   : > { %p1598_p4 = pneg %p1597_p2 }
  0x49   : > { %p1605_p10 = pnand %p1604_p5, %p1598_p4 }
  0x4b   : > { %1608 = shalt.err (!%p1605_p10)
}
  0x4c   : > { %1431 = dma.hbm_to_vmem [thread:$0]  (!%p1925_p6), %s2316_s3, 256, %s1929_s9, [#allocation12], %s1828_s29, %s1828_s29, %s1829_s8  }
  0x4d   : > { %s2317_s4 = sld [smem:[#allocation26_spill]] }
  0x53   : > { %s1609_s15 = scalar_lea.hbm %s2317_s4, 512 }
  0x54   : > { %p1610_p11 = scmp.ne.s32.totalorder %s2317_s4, %s1609_s15  ;;  %p1616_p0 = scmp.lt.u32.totalorder %s1609_s15, %s2317_s4 }
  0x56   : > { %p1612_p12 = pnand %p1610_p11, %p1941_p8 }
  0x58   : > { %p1613_p13 = pneg %p1612_p12 }
  0x5a   : > { %p1618_p2 = pnand %p1616_p0, %p1613_p13 }
  0x5c   : > { %1621 = shalt.err (!%p1618_p2)
}
  0x5d   : > { %s1622_s30 = scalar_lea.vmem %s249_s11, 512  ;;  %p1630_p5 = scmp.lt.s32.totalorder %s249_s11, %s249_s11 }
  0x5e   : > { %p1623_p4 = scmp.ne.s32.totalorder %s249_s11, %s1622_s30  ;;  %p1631_p10 = scmp.lt.s32.totalorder %s1622_s30, %s1622_s30 }
  0x60   : > { %p1625_p7 = pnand %p1623_p4, %p1941_p8  ;;  %p1632_p1 = por %p1631_p10, %p1630_p5 }
  0x62   : > { %p1626_p9 = pneg %p1625_p7 }
  0x64   : > { %p1633_p3 = pnand %p1632_p1, %p1626_p9 }
  0x66   : > { %1636 = shalt.err (!%p1633_p3)
}
  0x67   : > { %1434 = dma.hbm_to_vmem [thread:$0]  (!%p1925_p6), %s2317_s4, 512, %s249_s11, [#allocation12], %s1828_s29, %s1828_s29, %s1829_s8  }
  0x68   : > { %s1830_s12 = smov [#allocation14]   ;;  %s2318_s5 = sld [smem:[#allocation27_spill]] }
  0x69   : > { %s262_s13 = sshll.u32 %s1830_s12, 4  ;;  %s263_s13 = int_to_ptr.vmem [resolvable:$true] %s262_s13 }
  0x6e   : > { %s1637_s16 = scalar_lea.hbm %s2318_s5, 16 }
  0x6f   : > { %p1638_p1 = scmp.ne.s32.totalorder %s2318_s5, %s1637_s16  ;;  %p1644_p12 = scmp.lt.u32.totalorder %s1637_s16, %s2318_s5 }
  0x71   : > { %p1640_p3 = pnand %p1638_p1, %p1941_p8 }
  0x73   : > { %p1641_p11 = pneg %p1640_p3 }
  0x75   : > { %p1646_p13 = pnand %p1644_p12, %p1641_p11 }
  0x77   : > { %1649 = shalt.err (!%p1646_p13)
}
  0x78   : > { %s1650_s11 = scalar_lea.vmem %s263_s13, 16  ;;  %s1657_s29 = scalar_lea.vmem %s263_s13, 32 }
  0x79   : > { %p1651_p0 = scmp.ne.s32.totalorder %s263_s13, %s1650_s11  ;;  %p1658_p7 = scmp.lt.s32.totalorder %s263_s13, %s263_s13 }
  0x7a   : > { %p1659_p9 = scmp.lt.s32.totalorder %s1657_s29, %s1650_s11 }
  0x7b   : > { %p1653_p2 = pnand %p1651_p0, %p1941_p8 }
  0x7c   : > { %p1660_p5 = por %p1659_p9, %p1658_p7 }
  0x7d   : > { %p1654_p4 = pneg %p1653_p2 }
  0x7f   : > { %p1661_p10 = pnand %p1660_p5, %p1654_p4 }
  0x81   : > { %1664 = shalt.err (!%p1661_p10)
}
  0x82   : > { %1437 = dma.hbm_to_vmem [thread:$0]  (!%p1925_p6), %s2318_s5, 16, %s263_s13, [#allocation15]  }
  0x83   : > { %s1244_s17 = sadd.s32 4294967294, %s1823_s26   ;;  %s39_s10 = sadd.s32 1, %s1819_s25 }
  0x84   : > { %p41_p8 = scmp.ge.s32.totalorder %s39_s10, 2  ;;  %s48_s7 = sadd.s32 1, %s1811_s23 }
  0x85   : > { %p55_p1 = scmp.ne.s32.totalorder %s1811_s23, %s1807_s22  ;;  %p56_p3 = scmp.eq.s32.totalorder %s1823_s26, 0 }
  0x86   : > { %s2344_s10 = smov (%p41_p8, %s39_s10), 0  ;;  %p61_p12 = scmp.ne.s32.totalorder %s1807_s22, %s1803_s21 }
  0x87   : > { %2319 = sst [smem:[#allocation23_spill]] %s2344_s10  ;;  %p2039_p11 = por %p56_p3, %p55_p1 }
  0x88   : > { %s43_s13 = ssub.s32 %s1819_s25, %s2344_s10  ;;  %p197_p6 = scmp.eq.s32.totalorder %s1909_s27, 1 }
  0x89   : > { %p46_p13 = scmp.eq.s32.totalorder %s43_s13, 0  ;;  %p2321_p0 = scmp.eq.s32.totalorder %s1909_s27, 0 }
  0x8a   : > { %p2054_p4 = por %p197_p6, %p55_p1  ;;  %p203_p7 = scmp.eq.s32.totalorder %s1244_s17, 1 }
  0x8b   : > { %p2050_p2 = por %p2321_p0, %p61_p12  ;;  %p1453_p5 = scmp.lt.s32.totalorder %s1823_s26, 2 }
  0x8c   : > { %s2323_s15 = scalar_select %p2054_p4, 1, 0 }
  0x8d   : > { %s2322_s14 = scalar_select %p2050_p2, 1, 0 }
  0x8e   : > { %s2059_s16 = scalar_select %p46_p13, %s1811_s23, %s48_s7  }
  0x8f   : > { %p2061_p9 = por %p203_p7, %p61_p12  ;;  %s273_s19 = sand.u32 1, %s1811_s23  }
  0x90   : > { %s1252_s20 = sshll.u32 %s1819_s25, 6  ;;  %s2068_s30 = sshll.u32 %s273_s19, 2 }
  0x91   : > { %s2324_s18 = scalar_select %p2061_p9, 1, 0 }
  0x92   : > { %s2073_s8 = scalar_lea.hbm %s2296_s0, %s1252_s20  ;;  %s277_s9 = scalar_lea.vmem [#allocation5], %s2068_s30 }
  0x93   : > { %s285_s17 = sshll.u32 %s277_s9, 4  ;;  %p2078_p10 = pnand %p1453_p5, %p2039_p11  ;;  %s2082_s17 = int_to_ptr.vmem [resolvable:$true] %s285_s17 }
  0x94   : > { %s2087_s29 = scalar_lea.hbm %s2297_s1, %s1252_s20  ;;  %s274_s2 = scalar_lea.sflag [#allocation6], %s273_s19 }
  0x95   : > { %s1665_s3 = scalar_lea.hbm %s2073_s8, 64  ;;  %p1667_p1 = pneg %p2078_p10 }
  0x96   : > { %p1666_p8 = scmp.ne.s32.totalorder %s2073_s8, %s1665_s3  ;;  %s1670_s4 = scalar_lea.hbm %s2296_s0, 128 }
  0x97   : > { %p1671_p12 = scmp.lt.u32.totalorder %s2073_s8, %s2296_s0  ;;  %p1672_p6 = scmp.lt.u32.totalorder %s1670_s4, %s1665_s3 }
  0x98   : > { %p1668_p3 = pnand %p1667_p1, %p1666_p8  ;;  %p1674_p0 = scmp.lt.u32.totalorder %s1665_s3, %s2073_s8 }
  0x99   : > { %p1673_p13 = por %p1672_p6, %p1671_p12 }
  0x9a   : > { %p1669_p11 = pneg %p1668_p3 }
  0x9b   : > { %p1675_p7 = por %p1674_p0, %p1673_p13 }
  0x9d   : > { %p1676_p5 = pnand %p1675_p7, %p1669_p11 }
  0x9f   : > { %1679 = shalt.err (!%p1676_p5)
}
  0xa0   : > { %s1680_s19 = scalar_lea.vmem %s2082_s17, 64  ;;  %s1831_s20 = smov [#allocation5]  }
  0xa1   : > { %p1681_p8 = scmp.ne.s32.totalorder %s2082_s17, %s1680_s19  ;;  %s1685_s13 = sshll.u32 %s1831_s20, 4  ;;  %s1686_s13 = int_to_ptr.vmem [resolvable:$false] %s1685_s13 }
  0xa2   : > { %s1687_s5 = scalar_lea.vmem %s1686_s13, 128  ;;  %p1688_p4 = scmp.lt.s32.totalorder %s2082_s17, %s1686_s13 }
  0xa3   : > { %p1683_p3 = pnand %p1681_p8, %p1667_p1  ;;  %p1689_p12 = scmp.lt.s32.totalorder %s1687_s5, %s1680_s19 }
  0xa5   : > { %p1684_p9 = pneg %p1683_p3  ;;  %p1690_p6 = por %p1689_p12, %p1688_p4 }
  0xa7   : > { %p1691_p13 = pnand %p1690_p6, %p1684_p9 }
  0xa9   : > { %1694 = shalt.err (!%p1691_p13)
}
  0xaa   : > { %1441 = dma.hbm_to_vmem [thread:$0]  (!%p2078_p10), %s2073_s8, 64, %s2082_s17, %s274_s2  }
  0xab   : > { %s292_s3 = sand.u32 1, %s1823_s26   ;;  %s296_s4 = scalar_lea.vmem [#allocation8], %s2068_s30 }
  0xac   : > { %s303_s10 = sshll.u32 %s296_s4, 4  ;;  %s293_s11 = scalar_lea.sflag [#allocation9], %s292_s3  ;;  %s304_s10 = int_to_ptr.vmem [resolvable:$true] %s303_s10 }
  0xad   : > { %s1695_s12 = scalar_lea.hbm %s2087_s29, 64  ;;  %s1700_s20 = scalar_lea.hbm %s2297_s1, 128 }
  0xae   : > { %p1696_p4 = scmp.ne.s32.totalorder %s2087_s29, %s1695_s12  ;;  %p1701_p0 = scmp.lt.u32.totalorder %s2087_s29, %s2297_s1 }
  0xaf   : > { %p1702_p7 = scmp.lt.u32.totalorder %s1700_s20, %s1695_s12  ;;  %p1704_p8 = scmp.lt.u32.totalorder %s1695_s12, %s2087_s29 }
  0xb0   : > { %p1698_p9 = pnand %p1696_p4, %p1667_p1 }
  0xb1   : > { %p1703_p5 = por %p1702_p7, %p1701_p0 }
  0xb2   : > { %p1699_p11 = pneg %p1698_p9 }
  0xb3   : > { %p1705_p3 = por %p1704_p8, %p1703_p5 }
  0xb5   : > { %p1706_p12 = pnand %p1705_p3, %p1699_p11 }
  0xb7   : > { %1709 = shalt.err (!%p1706_p12)
}
  0xb8   : > { %s1710_s2 = scalar_lea.vmem %s304_s10, 64  ;;  %s1832_s30 = smov [#allocation8]  }
  0xb9   : > { %p1711_p6 = scmp.ne.s32.totalorder %s304_s10, %s1710_s2  ;;  %s1715_s8 = sshll.u32 %s1832_s30, 4  ;;  %s1716_s8 = int_to_ptr.vmem [resolvable:$false] %s1715_s8 }
  0xba   : > { %s1717_s17 = scalar_lea.vmem %s1716_s8, 128  ;;  %p1718_p9 = scmp.lt.s32.totalorder %s304_s10, %s1716_s8 }
  0xbb   : > { %p1713_p13 = pnand %p1711_p6, %p1667_p1  ;;  %p1719_p2 = scmp.lt.s32.totalorder %s1717_s17, %s1710_s2 }
  0xbd   : > { %p1714_p4 = pneg %p1713_p13  ;;  %p1720_p0 = por %p1719_p2, %p1718_p9 }
  0xbf   : > { %p1721_p7 = pnand %p1720_p0, %p1714_p4 }
  0xc1   : > { %1724 = shalt.err (!%p1721_p7)
}
  0xc2   : > { %1444 = dma.hbm_to_vmem [thread:$0]  (!%p2078_p10), %s2087_s29, 64, %s304_s10, %s293_s11  }
  0xc3   : > { %p2326_p11 = scmp.ne.s32.totalorder %s2312_s28, 0 }
  0xc4   : > { %s2138_s3 = sand.u32 (!%p2326_p11), 1, %s1807_s22   ;;  %p2327_p1 = scmp.ne.s32.totalorder (!%p2326_p11), %s2322_s14, 0 }
  0xc5   : > { %312 = sbr.rel (%p2326_p11) target bundleno = 1544 (0x608), region = 44  ;;  %s1256_s4 = sshll.u32 (!%p2326_p11), %s2138_s3, 2 }
  0xc6   : > { %s315_s12 = scalar_lea.sflag (!%p2326_p11), [#allocation6], %s2138_s3  ;;  %s318_s9 = scalar_lea.vmem (!%p2326_p11), [#allocation5], %s1256_s4 }
  0xcc   : > { %1778 = dma.done.wait (%p2327_p1), %s315_s12, 64  }
  0xcd   : > { %1780 = vsyncadd (%p2327_p1), %s315_s12, 4294967232  ;;  %s323_s7 = sand.u32 1, %s1909_s27   ;;  %s327_s28 = scalar_lea.vmem [#allocation8], %s1256_s4 }
  0xce   : > { %s324_s29 = scalar_lea.sflag [#allocation9], %s323_s7 }
  0xcf   : > { %1782 = dma.done.wait (%p2327_p1), %s324_s29, 64  }
  0xd0   : > { %1784 = vsyncadd (%p2327_p1), %s324_s29, 4294967232  ;;  %p2328_p2 = scmp.eq.s32.totalorder %s1909_s27, 0 }
  0xd2   : > { %1786 = dma.done.wait (%p2328_p2), [#allocation9], 256   ;;  %p2329_p10 = pmov %p2328_p2 }
  0xd3   : > { %p2330_p5 = pmov %p2328_p2 }
  0xd4   : > { %1788 = vsyncadd (%p2329_p10), [#allocation9], 4294967040 }
  0xd5   : > { %1790 = dma.done.wait (%p2330_p5), [#allocation12], 768   ;;  %p2331_p8 = pmov %p2328_p2 }
  0xd6   : > { %p2332_p3 = pmov %p2328_p2 }
  0xd7   : > { %1792 = vsyncadd (%p2331_p8), [#allocation12], 4294966528 }
  0xd8   : > { %1794 = dma.done.wait (%p2332_p3), [#allocation15], 16   ;;  %p2333_p12 = pmov %p2328_p2 }
  0xd9   : > { %v1833_v0 = vmov 0.0   ;;  %vm1834_vm0 = vmmov 0   ;;  %v1522_v1 = vld [vmem:[#allocation10] sm:$0xff]   ;;  %v1523_v2 = vld [vmem:[#allocation10 + $0x8] sm:$0xff]   ;;  %v378_v3 = vld [vmem:[%s318_s9] sm:$0xf] }
  0xda   : > { %1796 = vsyncadd (%p2333_p12), [#allocation15], 4294967280  ;;  %1327 = vmatprep.subr.bf16.mxu1 %v1833_v0  ;;  %1331 = vmatprep.mubr.msk.bf16.mxu1 %vm1834_vm0, %v1833_v0  ;;  %vm396_vm1 = vcmask 261120   ;;  %v1524_v4 = vld [vmem:[#allocation11] sm:$0xff]   ;;  %v1525_v5 = vld [vmem:[#allocation11 + $0x8] sm:$0xff]   ;;  %vm441_vm2 = vcmask 519168  }
  0xdb   : > { %1343 = vmatprep.subr.bf16.mxu0 %v1833_v0  ;;  %1345 = vmatprep.mubr.msk.bf16.mxu0 %vm1834_vm0, %v1833_v0  ;;  %v379_v6 = vld [vmem:[%s327_s28] sm:$0xf]  ;;  %vm506_vm3 = vcmask 130048   ;;  %s1835_s27 = smov 96   ;;  %s1836_s14 = smov 112   ;;  %vm572_vm4 = vcmask 1043456  }
  0xdc   : > { %1328 = vmatpush3.bf16.msra.mxu1 %v1522_v1  ;;  %s1837_s10 = smov 80   ;;  %s1838_s11 = smov 64   ;;  %vm553_vm5 = vcmask 64512   ;;  %vm619_vm6 = vcmask 125952   ;;  %vm746_vm7 = vcmask 257152   ;;  %vm873_vm8 = vcmask 388352  }
  0xdd   : > { %1329 = vmatprep.subr.bf16.mxu1 %v1833_v0  ;;  %s1839_s19 = smov 32   ;;  %s1840_s20 = smov 16   ;;  %vm1000_vm9 = vcmask 519552   ;;  %vm1042_vm10 = vcmask 523264  }
  0xde   : > { %s1841_s13 = smov 48   ;;  %s1262_s5 = sshll.u32 %s2138_s3, 3 }
  0xdf   : > { %s1294_s2 = sshll.u32 %s1815_s24, 7  ;;  %s376_s30 = scalar_lea.vmem [#allocation16], %s1262_s5 }
  0xe0   : > { %1330 = vmatpush3.bf16.msra.mxu1 %v1523_v2  ;;  %s1102_s8 = sshll.u32 %s376_s30, 4  ;;  %s2246_s12 = scalar_lea.hbm %s2302_s6, %s1294_s2  ;;  %s2248_s8 = int_to_ptr.vmem [resolvable:$true] %s1102_s8 }
  0xe1   : > { %1335 = vmatprep.subr.bf16.mxu1 %v1833_v0  ;;  %s1088_s24 = scalar_lea.sflag [#allocation7], %s2138_s3  ;;  %s1725_s9 = scalar_lea.vmem %s2248_s8, 128 }
  0xe2   : > { %p1726_p6 = scmp.ne.s32.totalorder %s2248_s8, %s1725_s9  ;;  %p2334_p13 = scmp.ne.s32.totalorder %s2323_s15, 0 }
  0xe3   : > { %1332 = vmatmul.mubr.msk.bf16.vlgmr.msra.gmra.mrb[0].mxu1 %vm396_vm1, %v378_v3  ;;  %s1842_s7 = smov [#allocation16]  }
  0xe4   : > { %1336 = vmatpush3.bf16.msra.mxu1 %v1524_v4  ;;  %1339 = vmatprep.mubr.msk.bf16.mxu1 %vm1834_vm0, %v1833_v0  ;;  %p1727_p4 = pnand %p1726_p6, %p2334_p13  ;;  %s1729_s29 = sshll.u32 %s1842_s7, 4  ;;  %s1730_s29 = int_to_ptr.vmem [resolvable:$false] %s1729_s29 }
  0xe5   : > { %1337 = vmatprep.subr.bf16.mxu1 %v1833_v0  ;;  %s1731_s28 = scalar_lea.vmem %s1730_s29, 256  ;;  %p1732_p0 = scmp.lt.s32.totalorder %s2248_s8, %s1730_s29 }
  0xe6   : > { %p1728_p9 = pneg %p1727_p4  ;;  %p1733_p7 = scmp.lt.s32.totalorder %s1731_s28, %s1725_s9 }
  0xe8   : > { %1338 = vmatpush3.bf16.msra.mxu1 %v1525_v5  ;;  %p1734_p11 = por %p1733_p7, %p1732_p0 }
  0xe9   : > { %1349 = vmatprep.subr.bf16.mxu1 %v1833_v0 }
  0xea   : > { %p1735_p1 = pnand %p1734_p11, %p1728_p9 }
  0xeb   : > { %1340 = vmatmul.mubr.msk.bf16.vlgmr.msra.gmra.mrb[4].mxu1 %vm396_vm1, %v379_v6 }
  0xec   : > { %1351 = vmatprep.mubr.msk.bf16.mxu1 %vm1834_vm0, %v1833_v0 }
 0x1b6   : > { %v434_v7 = vpop.f32.mrb[0].mxu1 }
 0x1b7   : > { %v440_v8 = vpack.c.bf16 %v434_v7, %v434_v7  ;;  %v1333_v9 = vpop.f32.mrb[1].mxu1 }
 0x1b8   : > { %v437_v10 = vpop.f32.mrb[2].mxu1 }
 0x1b9   : > { %442 = vst.msk [vmem:[#allocation2] sm:$0xf] %vm441_vm2, %v440_v8  ;;  %v1334_v11 = vpop.f32.mrb[3].mxu1 }
 0x1be   : > { %v496_v12 = vpop.f32.mrb[4].mxu1 }
 0x1bf   : > { %v502_v13 = vpack.c.bf16 %v496_v12, %v496_v12  ;;  %v1341_v14 = vpop.f32.mrb[5].mxu1 }
 0x1c0   : > { %v499_v15 = vpop.f32.mrb[6].mxu1  ;;  %v1529_v21 = vld [vmem:[#allocation2] ss:$0 sps:$4 sm:$0xff]  }
 0x1c1   : > { %503 = vst [vmem:[#allocation3] sm:$0xf] %v502_v13  ;;  %v1342_v16 = vpop.f32.mrb[7].mxu1  ;;  %v1530_v22 = vld [vmem:[#allocation2] ss:$0 sps:$4 sm:$0xff]  }
 0x1c2   : > { %v504_v23 = vld [vmem:[#allocation2] sm:$0xf] }
 0x1c3   : > { %v1531_v24 = vld [vmem:[#allocation2] ss:$0 sps:$4 sm:$0xff]  }
 0x1c8   : > { %v505_v17 = vld [vmem:[#allocation3] sm:$0xf] }
 0x1c9   : > { %v2179_v18 = vld [vmem:[#allocation3] ss:$0 sps:$4 sm:$0xff]   ;;  %v511_v19 = vsel %vm506_vm3, %v505_v17, 0  ;;  %v1270_v26 = vcombine.low %v505_v17, %v505_v17 }
 0x1ca   : > { %v2182_v20 = vld [vmem:[#allocation3] ss:$0 sps:$4 sm:$0xff]   ;;  %1344 = vmatpush3.bf16.xpose.msra.mxu0 %v511_v19  ;;  %758 = vrot.lane.b32.xlu1 %v2179_v18, %s1835_s27 }
 0x1cb   : > { %631 = vrot.lane.b32.xlu0 %v2182_v20, %s1836_s14  ;;  %1355 = vmatprep.subr.bf16.mxu0 %v1833_v0  ;;  %v1532_v25 = vld [vmem:[#allocation3] ss:$0 sps:$4 sm:$0xff]  }
 0x1ce   : > { %753 = vrot.lane.b32.xlu1 %v1529_v21, %s1835_s27 }
 0x1cf   : > { %626 = vrot.lane.b32.xlu0 %v1530_v22, %s1836_s14 }
 0x1d1   : > { %1346 = vmatmul.mubr.msk.bf16.vlgmr.msra.gmra.mrb[0].mxu0 %vm506_vm3, %v504_v23 }
 0x1d2   : > { %880 = vrot.lane.b32.xlu1 %v1531_v24, %s1837_s10  ;;  %1357 = vmatprep.mubr.msk.bf16.mxu0 %vm1834_vm0, %v1833_v0 }
 0x1d3   : > { %885 = vrot.lane.b32.xlu0 %v1532_v25, %s1837_s10 }
 0x1d6   : > { %567 = vrot.lane.b32.xlu1 %v1270_v26, %s1838_s11 }
 0x23c   : > { %v759_v27 = vpop.permute.xlu1 %758 }
 0x23d   : > { %v632_v28 = vpop.permute.xlu0 %631  ;;  %v764_v33 = vsel %vm506_vm3, %v759_v27, 0 }
 0x23e   : > { %v637_v29 = vsel %vm506_vm3, %v632_v28, 0 }
 0x23f   : > { %1356 = vmatpush3.bf16.xpose.msra.mxu0 %v637_v29 }
 0x240   : > { %v754_v30 = vpop.permute.xlu1 %753  ;;  %1367 = vmatprep.subr.bf16.mxu0 %v1833_v0 }
 0x241   : > { %v627_v32 = vpop.permute.xlu0 %626 }
 0x244   : > { %v881_v31 = vpop.permute.xlu1 %880 }
 0x245   : > { %v886_v36 = vpop.permute.xlu0 %885 }
 0x246   : > { %1358 = vmatmul.mubr.msk.bf16.vlgmr.msra.gmra.mrb[4].mxu0 %vm506_vm3, %v627_v32  ;;  %v891_v37 = vsel %vm506_vm3, %v886_v36, 0 }
 0x247   : > { %1368 = vmatpush3.bf16.xpose.msra.mxu0 %v764_v33  ;;  %1369 = vmatprep.mubr.msk.bf16.mxu0 %vm1834_vm0, %v1833_v0 }
 0x248   : > { %v568_v34 = vpop.permute.xlu1 %567  ;;  %1379 = vmatprep.subr.bf16.mxu0 %v1833_v0 }
 0x249   : > { %v574_v35 = vsel %vm572_vm4, %v568_v34, 0 }
 0x24a   : > { %1350 = vmatpush3.bf16.msra.mxu1 %v574_v35 }
 0x24b   : > { %1361 = vmatprep.subr.bf16.mxu1 %v1833_v0 }
 0x24e   : > { %1370 = vmatmul.mubr.msk.bf16.vlgmr.msra.gmra.mrb[8].mxu0 %vm506_vm3, %v754_v30 }
 0x24f   : > { %1380 = vmatpush3.bf16.xpose.msra.mxu0 %v891_v37  ;;  %1381 = vmatprep.mubr.msk.bf16.mxu0 %vm1834_vm0, %v1833_v0 }
 0x250   : > { %1391 = vmatprep.subr.bf16.mxu0 %v1833_v0 }
 0x256   : > { %1382 = vmatmul.mubr.msk.bf16.vlgmr.msra.gmra.mrb[12].mxu0 %vm506_vm3, %v881_v31 }
 0x257   : > { %1399 = vmatprep.mubr.msk.bf16.mxu0 %vm1834_vm0, %v1833_v0 }
 0x2a4   : > { %v547_v38 = vpop.f32.mrb[0].mxu0 }
 0x2a5   : > { %v1347_v39 = vpop.f32.mrb[1].mxu0  ;;  %v554_v40 = vsel %vm553_vm5, %v547_v38, -inf }
 0x2a6   : > { %555 = vmax.xlane.f32.xlu0 %v554_v40  ;;  %v550_v41 = vpop.f32.mrb[2].mxu0 }
 0x2a7   : > { %v1348_v42 = vpop.f32.mrb[3].mxu0 }
 0x2a8   : > { %v1534_v42 = vld [vmem:[#allocation13 + $0x8] sm:$0xff]  }
 0x319   : > { %v673_v43 = vpop.f32.mrb[4].mxu0 }
 0x31a   : > { %v1359_v44 = vpop.f32.mrb[5].mxu0  ;;  %v679_v45 = vsel %vm553_vm5, %v673_v43, -inf }
 0x31b   : > { %680 = vmax.xlane.f32.xlu1 %v679_v45  ;;  %v676_v46 = vpop.f32.mrb[6].mxu0 }
 0x31c   : > { %v1360_v47 = vpop.f32.mrb[7].mxu0 }
 0x31d   : > { %v1535_v47 = vld [vmem:[#allocation13 + $0x10] sm:$0xff]  }
 0x321   : > { %v800_v48 = vpop.f32.mrb[8].mxu0 }
 0x322   : > { %v1371_v49 = vpop.f32.mrb[9].mxu0  ;;  %v806_v50 = vsel %vm553_vm5, %v800_v48, -inf }
 0x323   : > { %807 = vmax.xlane.f32.xlu0 %v806_v50  ;;  %v803_v51 = vpop.f32.mrb[10].mxu0 }
 0x324   : > { %v1372_v52 = vpop.f32.mrb[11].mxu0  ;;  %v1536_v51 = vld [vmem:[#allocation13 + $0x18] sm:$0xff]  }
 0x329   : > { %v927_v53 = vpop.f32.mrb[12].mxu0 }
 0x32a   : > { %v1383_v54 = vpop.f32.mrb[13].mxu0  ;;  %v933_v55 = vsel %vm553_vm5, %v927_v53, -inf }
 0x32b   : > { %934 = vmax.xlane.f32.xlu0 %v933_v55  ;;  %v930_v56 = vpop.f32.mrb[14].mxu0 }
 0x32c   : > { %816 = vrot.lane.b32.xlu1 %v2179_v18, %s1839_s19  ;;  %v1384_v57 = vpop.f32.mrb[15].mxu0 }
 0x330   : > { %943 = vrot.lane.b32.xlu1 %v1532_v25, %s1840_s20 }
 0x333   : > { %v556_v58 = vpop.xlane.xlu0 %555 }
 0x334   : > { %v557_v59 = vsub.f32 %v547_v38, %v556_v58  ;;  %v1533_v38 = vld [vmem:[#allocation13] sm:$0xff]  }
 0x335   : > { %1392 = vmatpush3.bf16.msra.mxu0 %v1533_v38 }
 0x336   : > { %v558_v60 = vmul.f32 1.442695, %v557_v59  ;;  %1393 = vmatprep.subr.bf16.mxu0 %v1833_v0 }
 0x338   : > { %1537 = vpow2.f32 %v558_v60 }
 0x339   : > { %1394 = vmatpush3.bf16.msra.mxu0 %v1534_v42 }
 0x33a   : > { %1395 = vmatprep.subr.bf16.mxu0 %v1833_v0 }
 0x33d   : > { %1396 = vmatpush3.bf16.msra.mxu0 %v1535_v47 }
 0x33e   : > { %1397 = vmatprep.subr.bf16.mxu0 %v1833_v0 }
 0x341   : > { %689 = vrot.lane.b32.xlu0 %v2182_v20, %s1841_s13  ;;  %1398 = vmatpush3.bf16.msra.mxu0 %v1536_v51 }
 0x342   : > { %v1538_v61 = vpop.eup %1537 }
 0x343   : > { %v563_v62 = vpack.c.bf16 %v1538_v61, %v1538_v61  ;;  %v560_v23 = vsel %vm553_vm5, %v1538_v61, 0.0 }
 0x345   : > { %1352 = vmatmul.mubr.msk.bf16.vlgmr.msra.gmra.mrb[8].mxu1 %vm553_vm5, %v563_v62 }
 0x346   : > { %1363 = vmatprep.mubr.msk.bf16.mxu1 %vm1834_vm0, %v1833_v0 }
 0x3a8   : > { %v681_v63 = vpop.xlane.xlu1 %680 }
 0x3a9   : > { %v682_v1 = vsub.f32 %v673_v43, %v681_v63 }
 0x3ab   : > { %v683_v2 = vmul.f32 1.442695, %v682_v1  ;;  %v1287_v1 = vld [vmem:[#allocation14] ss:$0 sm:$0xff] }
 0x3ac   : > { %v817_v13 = vpop.permute.xlu1 %816 }
 0x3ad   : > { %1539 = vpow2.f32 %v683_v2  ;;  %v822_v17 = vsel %vm572_vm4, %v817_v13, 0 }
 0x3b0   : > { %v808_v3 = vpop.xlane.xlu0 %807  ;;  %v944_v18 = vpop.permute.xlu1 %943 }
 0x3b1   : > { %v809_v4 = vsub.f32 %v800_v48, %v808_v3  ;;  %v949_v22 = vsel %vm572_vm4, %v944_v18, 0 }
 0x3b3   : > { %v810_v5 = vmul.f32 1.442695, %v809_v4 }
 0x3b5   : > { %1541 = vpow2.f32 %v810_v5 }
 0x3b7   : > { %v1540_v6 = vpop.eup %1539 }
 0x3b8   : > { %v935_v7 = vpop.xlane.xlu0 %934  ;;  %v685_v8 = vsel %vm553_vm5, %v1540_v6, 0.0  ;;  %v688_v15 = vpack.c.bf16 %v1540_v6, %v1540_v6 }
 0x3b9   : > { %v936_v9 = vsub.f32 %v927_v53, %v935_v7  ;;  %686 = vadd.xlane.f32.xlu0 %v685_v8 }
 0x3bb   : > { %v937_v10 = vmul.f32 1.442695, %v936_v9 }
 0x3bc   : > { %v690_v11 = vpop.permute.xlu0 %689 }
 0x3bd   : > { %1543 = vpow2.f32 %v937_v10  ;;  %v695_v12 = vsel %vm572_vm4, %v690_v11, 0 }
 0x3be   : > { %1362 = vmatpush3.bf16.msra.mxu1 %v695_v12 }
 0x3bf   : > { %v1542_v14 = vpop.eup %1541  ;;  %1373 = vmatprep.subr.bf16.mxu1 %v1833_v0 }
 0x3c0   : > { %v812_v16 = vsel %vm553_vm5, %v1542_v14, 0.0  ;;  %v815_v20 = vpack.c.bf16 %v1542_v14, %v1542_v14 }
 0x3c1   : > { %813 = vadd.xlane.f32.xlu1 %v812_v16  ;;  %1364 = vmatmul.mubr.msk.bf16.vlgmr.msra.gmra.mrb[12].mxu1 %vm553_vm5, %v688_v15 }
 0x3c2   : > { %1374 = vmatpush3.bf16.msra.mxu1 %v822_v17  ;;  %1375 = vmatprep.mubr.msk.bf16.mxu1 %vm1834_vm0, %v1833_v0 }
 0x3c3   : > { %1385 = vmatprep.subr.bf16.mxu1 %v1833_v0 }
 0x3c7   : > { %v1544_v19 = vpop.eup %1543 }
 0x3c8   : > { %v939_v21 = vsel %vm553_vm5, %v1544_v19, 0.0  ;;  %v942_v24 = vpack.c.bf16 %v1544_v19, %v1544_v19 }
 0x3c9   : > { %940 = vadd.xlane.f32.xlu0 %v939_v21  ;;  %1376 = vmatmul.mubr.msk.bf16.vlgmr.msra.gmra.mrb[16].mxu1 %vm553_vm5, %v815_v20 }
 0x3ca   : > { %1386 = vmatpush3.bf16.msra.mxu1 %v949_v22  ;;  %1387 = vmatprep.mubr.msk.bf16.mxu1 %vm1834_vm0, %v1833_v0 }
 0x3cd   : > { %561 = vadd.xlane.f32.xlu0 %v560_v23 }
 0x3d1   : > { %1388 = vmatmul.mubr.msk.bf16.vlgmr.msra.gmra.mrb[20].mxu1 %vm553_vm5, %v942_v24 }
 0x418   : > { %v610_v25 = vpop.f32.mrb[8].mxu1 }
 0x419   : > { %v1353_v26 = vpop.f32.mrb[9].mxu1 }
 0x41a   : > { %v613_v27 = vpop.f32.mrb[10].mxu1 }
 0x41b   : > { %v1354_v28 = vpop.f32.mrb[11].mxu1 }
 0x446   : > { %v687_v29 = vpop.xlane.xlu0 %686 }
 0x44e   : > { %v814_v35 = vpop.xlane.xlu1 %813 }
 0x456   : > { %v941_v30 = vpop.xlane.xlu0 %940 }
 0x45a   : > { %v562_v31 = vpop.xlane.xlu0 %561 }
 0x45b   : > { %1545 = vrcp.f32 %v562_v31 }
 0x45c   : > { %1547 = vrcp.f32 %v687_v29 }
 0x45d   : > { %1549 = vrcp.f32 %v814_v35 }
 0x45e   : > { %1551 = vrcp.f32 %v941_v30 }
 0x465   : > { %v1546_v32 = vpop.eup %1545 }
 0x466   : > { %v617_v33 = vmul.f32 %v1546_v32, %v610_v25  ;;  %v1548_v36 = vpop.eup %1547 }
 0x467   : > { %v1550_v45 = vpop.eup %1549 }
 0x468   : > { %v618_v34 = vpack.c.bf16 %v617_v33, %v617_v33  ;;  %v1552_v54 = vpop.eup %1551 }
 0x46a   : > { %620 = vst.msk [vmem:[#allocation4] sm:$0xf] %vm619_vm6, %v618_v34 }
 0x494   : > { %v731_v37 = vpop.f32.mrb[12].mxu1 }
 0x495   : > { %v738_v39 = vmul.f32 %v1548_v36, %v731_v37  ;;  %v1365_v40 = vpop.f32.mrb[13].mxu1 }
 0x496   : > { %v734_v41 = vpop.f32.mrb[14].mxu1 }
 0x497   : > { %v1297_v43 = vpack.c.bf16 %v738_v39, %v738_v39  ;;  %v1366_v44 = vpop.f32.mrb[15].mxu1 }
 0x499   : > { %743 = vrot.lane.b32.xlu1 %v1297_v43, %s1840_s20 }
 0x49c   : > { %v858_v46 = vpop.f32.mrb[16].mxu1 }
 0x49d   : > { %v865_v48 = vmul.f32 %v1550_v45, %v858_v46  ;;  %v1377_v49 = vpop.f32.mrb[17].mxu1 }
 0x49e   : > { %v861_v50 = vpop.f32.mrb[18].mxu1 }
 0x49f   : > { %v1298_v52 = vpack.c.bf16 %v865_v48, %v865_v48  ;;  %v1378_v53 = vpop.f32.mrb[19].mxu1 }
 0x4a1   : > { %870 = vrot.lane.b32.xlu0 %v1298_v52, %s1839_s19 }
 0x4a4   : > { %v985_v55 = vpop.f32.mrb[20].mxu1 }
 0x4a5   : > { %v992_v56 = vmul.f32 %v1552_v54, %v985_v55  ;;  %v1389_v57 = vpop.f32.mrb[21].mxu1 }
 0x4a6   : > { %v988_v58 = vpop.f32.mrb[22].mxu1 }
 0x4a7   : > { %v1299_v59 = vpack.c.bf16 %v992_v56, %v992_v56  ;;  %v1390_v60 = vpop.f32.mrb[23].mxu1 }
 0x4a9   : > { %997 = vrot.lane.b32.xlu1 %v1299_v59, %s1841_s13 }
 0x50b   : > { %v744_v61 = vpop.permute.xlu1 %743 }
 0x50c   : > { %747 = vst.msk [vmem:[#allocation4] sm:$0xf] %vm746_vm7, %v744_v61 }
 0x513   : > { %v871_v62 = vpop.permute.xlu0 %870 }
 0x514   : > { %874 = vst.msk [vmem:[#allocation4] sm:$0xf] %vm873_vm8, %v871_v62 }
 0x51b   : > { %v998_v0 = vpop.permute.xlu1 %997 }
 0x51c   : > { %1001 = vst.msk [vmem:[#allocation4] sm:$0xf] %vm1000_vm9, %v998_v0 }
 0x523   : > { %v1002_v63 = vld [vmem:[#allocation4] sm:$0xf] }
 0x524   : > { %1400 = vmatmul.mubr.msk.bf16.vlgmr.msra.gmra.mrb[16].mxu0 %vm1042_vm10, %v1002_v63 }
 0x5f7   : > { %v1080_v2 = vpop.f32.mrb[16].mxu0 }
 0x5f8   : > { %v1081_v3 = vadd.f32 %v1287_v1, %v1080_v2  ;;  %v1401_v4 = vpop.f32.mrb[17].mxu0 }
 0x5f9   : > { %v1083_v5 = vpop.f32.mrb[18].mxu0 }
 0x5fa   : > { %v1402_v6 = vpop.f32.mrb[19].mxu0  ;;  %1086 = vst.msk [vmem:[%s376_s30] sm:$0xff] %vm396_vm1, %v1081_v3 }
 0x5fb   : > { %1738 = shalt.err (!%p1735_p1)
}
 0x5fc   : > { %s1739_s3 = scalar_lea.hbm %s2246_s12, 128  ;;  %s1743_s10 = scalar_lea.hbm %s2302_s6, 256 }
 0x5fd   : > { %p1740_p2 = scmp.ne.s32.totalorder %s2246_s12, %s1739_s3  ;;  %p1744_p8 = scmp.lt.u32.totalorder %s2246_s12, %s2302_s6 }
 0x5fe   : > { %p1745_p3 = scmp.lt.u32.totalorder %s1743_s10, %s1739_s3  ;;  %p1747_p6 = scmp.lt.u32.totalorder %s1739_s3, %s2246_s12 }
 0x5ff   : > { %p1741_p10 = pnand %p1740_p2, %p2334_p13 }
 0x600   : > { %p1746_p12 = por %p1745_p3, %p1744_p8 }
 0x601   : > { %p1742_p5 = pneg %p1741_p10 }
 0x602   : > { %p1748_p4 = por %p1747_p6, %p1746_p12 }
 0x604   : > { %p1749_p9 = pnand %p1748_p4, %p1742_p5 }
 0x606   : > { %1752 = shalt.err (!%p1749_p9)
}
 0x607   : > { %1423 = dma.vmem_to_hbm [thread:$0]  (%p2334_p13), %s2248_s8, 128, %s2246_s12, %s1088_s24  }
 0x608 PF: > { %s1114_s20 = sand.u32 1, %s1803_s21   ;;  %p2335_p0 = scmp.ne.s32.totalorder %s2324_s18, 0 }
 0x609   : > { %p2336_p7 = scmp.ge.s32.totalorder %s1823_s26, 2  ;;  %s1115_s13 = scalar_lea.sflag [#allocation7], %s1114_s20 }
 0x60b   : > { %p1446_p11 = pnand %p2336_p7, %p2335_p0 }
 0x60d   : > { %1798 = dma.done.wait (!%p1446_p11), %s1115_s13, 128  }
 0x60e   : > { %1800 = vsyncadd (!%p1446_p11), %s1115_s13, 4294967168  ;;  %s27_s26 = sadd.s32 1, %s1823_s26   ;;  %s2337_s15 = sld [smem:[#allocation23_spill]] }
 0x60f   : > { %p24_p1 = scmp.ge.s32.totalorder %s27_s26, 4   ;;  %s2338_s21 = smov %s1807_s22 }
 0x610   : > { %s2339_s22 = smov %s1811_s23  ;;  %s2340_s23 = smov %s2059_s16 }
 0x611   : > { %s2341_s24 = smov %s1819_s25  ;;  %26 = sbr.rel (!%p24_p1) target bundleno = 15 (0xf), region = 118 }
 0x614   : > { %s2342_s25 = smov %s2337_s15 }
 0x618   :  { %1120 = vsyncpa [#allocation6], 1 }
 0x619   :  { %1122 = vsyncpa [#allocation6 + $0x1], 1 }
 0x61a   :  { %1123 = vsyncpa [#allocation9], 1 }
 0x61b   :  { %1125 = vsyncpa [#allocation9 + $0x1], 1 }
 0x61c   :  { %1126 = vsyncpa [#allocation12], 1 }
 0x61d   :  { %1127 = vsyncpa [#allocation15], 1 }
 0x61e   :  { %1128 = vsyncpa [#allocation7], 1 }
 0x61f   :  { %1130 = vsyncpa [#allocation7 + $0x1], 1 }

</bundles_post_ra>
